<compile_context>
chip_gen: v6e
topology: v6e:2x2x1
jax: 0.10.0
libtpu: 0.0.40
codegen_flags: <defaults>
</compile_context>

<pallas_src>
import functools

import jax
import jax.numpy as jnp
from jax.experimental import pallas as pl
from jax.experimental.pallas import tpu as pltpu

_LANE = 128
_MAX_TILE_ROWS = 4096  # 4096*128*4B = 2 MiB per input tile; 2 inputs x 2 bufs = 8 MiB


def _pow_gamma(pt, gamma):
    """pt ** gamma, specialized for small integer gamma (avoids exp/log on EUP)."""
    g = float(gamma)
    if g == 0.0:
        return jnp.ones_like(pt)
    if g.is_integer() and 0.0 < g <= 4.0:
        r = pt
        for _ in range(int(g) - 1):
            r = r * pt
        return r
    return pt ** g


def _focal_loss_kernel(pred_ref, target_ref, out_ref, *, gamma, alpha, tile_rows, numel):
    """Writes an (8, 128) partial sum of the element-wise focal loss for this tile."""
    x = pred_ref[...].astype(jnp.float32)
    t = target_ref[...].astype(jnp.float32)

    # sigmoid(pred)
    s = jax.nn.sigmoid(x)

    # pt = (1 - s) * t + s * (1 - t)
    pt = (1.0 - s) * t + s * (1.0 - t)

    # focal_weight = (alpha*t + (1-alpha)*(1-t)) * pt**gamma
    focal_weight = (alpha * t + (1.0 - alpha) * (1.0 - t)) * _pow_gamma(pt, gamma)

    # BCE with logits (numerically stable): max(x,0) - x*t + log1p(exp(-|x|))
    bce = jnp.maximum(x, 0.0) - x * t + jnp.log1p(jnp.exp(-jnp.abs(x)))

    loss = bce * focal_weight

    # Mask out flattened-tail padding so it does not bias the mean.
    i = pl.program_id(0)
    row_iota = jax.lax.broadcasted_iota(jnp.int32, (tile_rows, _LANE), 0)
    lane_iota = jax.lax.broadcasted_iota(jnp.int32, (tile_rows, _LANE), 1)
    flat_idx = (i * tile_rows + row_iota) * _LANE + lane_iota
    loss = jnp.where(flat_idx < numel, loss, 0.0)

    # Collapse only the row axis to an (8, 128) partial sum; the cheap final
    # cross-lane reduce is done once in the wrapper.
    partial = loss.reshape(tile_rows // 8, 8, _LANE).sum(axis=0)
    out_ref[...] = partial


def focal_loss(pred, target, *, gamma=2.0, alpha=0.25, loss_weight=1.0):
    """FocalLoss.forward with reduction='mean', weight=None, avg_factor=None."""
    assert pred.shape == target.shape, "pred and target should be in the same shape."
    numel = int(pred.size)
    scale = float(loss_weight) / float(numel)  # 'mean' reduction + loss_weight

    # Lane-dense flattened view, zero-padded to a whole number of tiles.
    pred_flat = pred.reshape(-1)
    target_flat = target.reshape(-1)

    rows_needed = pl.cdiv(numel, _LANE)
    tile_rows = min(_MAX_TILE_ROWS, max(8, ((rows_needed + 7) // 8) * 8))
    num_tiles = pl.cdiv(rows_needed, tile_rows)
    padded_rows = num_tiles * tile_rows
    pad = padded_rows * _LANE - numel
    if pad:
        pred_flat = jnp.pad(pred_flat, (0, pad))
        target_flat = jnp.pad(target_flat, (0, pad))
    pred2d = pred_flat.reshape(padded_rows, _LANE)
    target2d = target_flat.reshape(padded_rows, _LANE)

    kernel = functools.partial(
        _focal_loss_kernel,
        gamma=float(gamma),
        alpha=float(alpha),
        tile_rows=tile_rows,
        numel=numel,
    )

    # VMEM budget: 2 inputs x 2 buffers x tile + small output, plus headroom.
    tile_bytes = tile_rows * _LANE * 4
    vmem_limit = min(96 * 1024 * 1024, 4 * tile_bytes + (4 << 20))

    partials = pl.pallas_call(
        kernel,
        out_shape=jax.ShapeDtypeStruct((num_tiles * 8, _LANE), jnp.float32),
        grid_spec=pltpu.PrefetchScalarGridSpec(
            num_scalar_prefetch=0,
            grid=(num_tiles,),
            in_specs=[
                pl.BlockSpec((tile_rows, _LANE), lambda i: (i, 0)),
                pl.BlockSpec((tile_rows, _LANE), lambda i: (i, 0)),
            ],
            out_specs=pl.BlockSpec((8, _LANE), lambda i: (i, 0)),
        ),
        compiler_params=pltpu.CompilerParams(
            dimension_semantics=("parallel",),
            vmem_limit_bytes=int(vmem_limit),
        ),
    )(pred2d, target2d)

    # Tiny final reduction + mean/loss_weight scaling in plain JAX.
    return jnp.sum(partials) * scale


def _focal_loss_ref(pred, target, *, gamma=2.0, alpha=0.25, loss_weight=1.0):
    """Pure-JAX reference mirroring PyTorch's sigmoid_focal_loss (mean reduction)."""
    pred = pred.astype(jnp.float32)
    target = target.astype(jnp.float32)
    s = jax.nn.sigmoid(pred)
    pt = (1.0 - s) * target + s * (1.0 - target)
    fw = (alpha * target + (1.0 - alpha) * (1.0 - target)) * (pt ** gamma)
    bce = jnp.maximum(pred, 0.0) - pred * target + jnp.log1p(jnp.exp(-jnp.abs(pred)))
    return loss_weight * jnp.mean(bce * fw)


if __name__ == "__main__":
    key = jax.random.PRNGKey(0)
    k_pred, k_tgt = jax.random.split(key)

    N, C = 8, 16  # batch of 8 samples, 16 classes (one-hot / multi-label targets)
    pred = jax.random.normal(k_pred, (N, C), dtype=jnp.float32)
    target = jax.random.bernoulli(k_tgt, p=0.25, shape=(N, C)).astype(jnp.float32)

    loss = focal_loss(pred, target, gamma=2.0, alpha=0.25, loss_weight=1.0)
    loss = jax.block_until_ready(loss)

    ref = _focal_loss_ref(pred, target, gamma=2.0, alpha=0.25, loss_weight=1.0)
    assert jnp.allclose(loss, ref, rtol=1e-5, atol=1e-6), (loss, ref)

    # TODO(synk): sample-wise `weight`, `avg_factor` and reduction_override paths
    # (None / 'mean' defaults implemented; 'none'/'sum' not exposed here).
    print("KERNEL_OK")
</pallas_src>

<mosaic_0001>
module attributes {stable_mosaic.version = 11 : i64} {
  func.func @_focal_loss_kernel(%arg0: i32, %arg1: memref<8x128xf32, #tpu.memory_space<vmem>>, %arg2: memref<8x128xf32, #tpu.memory_space<vmem>>, %arg3: memref<8x128xf32, #tpu.memory_space<vmem>>) attributes {dimension_semantics = [#tpu.dimension_semantics<parallel>], iteration_bounds = array<i64: 1>, scalar_prefetch = 0 : i64, scratch_operands = 0 : i64, tpu.core_type = #tpu.core_type<tc>, window_params = [{transform_indices = @transform_0, window_bounds = array<i64: 8, 128>}, {transform_indices = @transform_1, window_bounds = array<i64: 8, 128>}, {transform_indices = @transform_2, window_bounds = array<i64: 8, 128>}]} {
    %c0 = arith.constant 0 : index
    %c0_0 = arith.constant 0 : index
    %0 = vector.load %arg1[%c0, %c0_0] : memref<8x128xf32, #tpu.memory_space<vmem>>, vector<8x128xf32>
    %c0_1 = arith.constant 0 : index
    %c0_2 = arith.constant 0 : index
    %1 = vector.load %arg2[%c0_1, %c0_2] : memref<8x128xf32, #tpu.memory_space<vmem>>, vector<8x128xf32>
    %2 = arith.negf %0 : vector<8x128xf32>
    %3 = math.exp %2 : vector<8x128xf32>
    %cst = arith.constant 1.000000e+00 : f32
    %4 = vector.broadcast %cst : f32 to vector<8x128xf32>
    %5 = arith.addf %4, %3 : vector<8x128xf32>
    %6 = arith.divf %4, %5 : vector<8x128xf32>
    %cst_3 = arith.constant 1.000000e+00 : f32
    %7 = vector.broadcast %cst_3 : f32 to vector<8x128xf32>
    %8 = arith.subf %7, %6 : vector<8x128xf32>
    %9 = arith.mulf %8, %1 : vector<8x128xf32>
    %cst_4 = arith.constant 1.000000e+00 : f32
    %10 = vector.broadcast %cst_4 : f32 to vector<8x128xf32>
    %11 = arith.subf %10, %1 : vector<8x128xf32>
    %12 = arith.mulf %6, %11 : vector<8x128xf32>
    %13 = arith.addf %9, %12 : vector<8x128xf32>
    %cst_5 = arith.constant 2.500000e-01 : f32
    %14 = vector.broadcast %cst_5 : f32 to vector<8x128xf32>
    %15 = arith.mulf %14, %1 : vector<8x128xf32>
    %cst_6 = arith.constant 1.000000e+00 : f32
    %16 = vector.broadcast %cst_6 : f32 to vector<8x128xf32>
    %17 = arith.subf %16, %1 : vector<8x128xf32>
    %cst_7 = arith.constant 7.500000e-01 : f32
    %18 = vector.broadcast %cst_7 : f32 to vector<8x128xf32>
    %19 = arith.mulf %18, %17 : vector<8x128xf32>
    %20 = arith.addf %15, %19 : vector<8x128xf32>
    %21 = arith.mulf %13, %13 : vector<8x128xf32>
    %22 = arith.mulf %20, %21 : vector<8x128xf32>
    %cst_8 = arith.constant 0.000000e+00 : f32
    %23 = vector.broadcast %cst_8 : f32 to vector<8x128xf32>
    %24 = arith.maximumf %0, %23 : vector<8x128xf32>
    %25 = arith.mulf %0, %1 : vector<8x128xf32>
    %26 = arith.subf %24, %25 : vector<8x128xf32>
    %27 = math.absf %0 : vector<8x128xf32>
    %cst_9 = arith.constant 0.000000e+00 : f32
    %28 = vector.broadcast %cst_9 : f32 to vector<8x128xf32>
    %29 = arith.subf %28, %27 : vector<8x128xf32>
    %30 = math.exp %29 : vector<8x128xf32>
    %31 = math.log1p %30 : vector<8x128xf32>
    %32 = arith.addf %26, %31 : vector<8x128xf32>
    %33 = arith.mulf %32, %22 : vector<8x128xf32>
    %34 = tpu.iota {dimensions = array<i32: 0>} : vector<8x128xi32>
    %35 = tpu.iota {dimensions = array<i32: 1>} : vector<8x128xi32>
    %c8_i32 = arith.constant 8 : i32
    %36 = arith.muli %arg0, %c8_i32 : i32
    %37 = vector.broadcast %36 : i32 to vector<8x128xi32>
    %38 = arith.addi %37, %34 : vector<8x128xi32>
    %c128_i32 = arith.constant 128 : i32
    %39 = vector.broadcast %c128_i32 : i32 to vector<8x128xi32>
    %40 = arith.muli %38, %39 : vector<8x128xi32>
    %41 = arith.addi %40, %35 : vector<8x128xi32>
    %c128_i32_10 = arith.constant 128 : i32
    %42 = vector.broadcast %c128_i32_10 : i32 to vector<8x128xi32>
    %43 = arith.cmpi slt, %41, %42 : vector<8x128xi32>
    %cst_11 = arith.constant 0.000000e+00 : f32
    %44 = vector.broadcast %cst_11 : f32 to vector<8x128xf32>
    %45 = arith.select %43, %33, %44 : vector<8x128xi1>, vector<8x128xf32>
    %46 = vector.shape_cast %45 : vector<8x128xf32> to vector<1x8x128xf32>
    %cst_12 = arith.constant dense<0.000000e+00> : vector<8x128xf32>
    %47 = vector.multi_reduction <add>, %46, %cst_12 [0] : vector<1x8x128xf32> to vector<8x128xf32>
    %c0_13 = arith.constant 0 : index
    %c0_14 = arith.constant 0 : index
    %48 = vector.load %arg3[%c0_13, %c0_14] : memref<8x128xf32, #tpu.memory_space<vmem>>, vector<8x128xf32>
    tpu.vector_store %arg3[%c0_13, %c0_14], %47 {strides = array<i32>} : memref<8x128xf32, #tpu.memory_space<vmem>>, vector<8x128xf32>,
    return
  }
  func.func @transform_0(%arg0: i32) -> (i32, i32) {
    %c0_i32 = arith.constant 0 : i32
    %c0_i32_0 = arith.constant 0 : i32
    return %arg0, %c0_i32 : i32, i32
  }
  func.func @transform_1(%arg0: i32) -> (i32, i32) {
    %c0_i32 = arith.constant 0 : i32
    %c0_i32_0 = arith.constant 0 : i32
    return %arg0, %c0_i32 : i32, i32
  }
  func.func @transform_2(%arg0: i32) -> (i32, i32) {
    %c0_i32 = arith.constant 0 : i32
    %c0_i32_0 = arith.constant 0 : i32
    return %arg0, %c0_i32 : i32, i32
  }
}

</mosaic_0001>

<bundles_post_ra>
// kernel: tpu_custom_call.1
= control target key start
LH: loop header
LB: loop body
LE: loop exit
PB: predicated region body
PF: predicated region fallthrough
CT: control target
= control target key end

     0   :  { %7 = vsyncpa [#allocation3], 0  ;;  %s206_s0 = inlined_call_operand.hbm [shape: f32[8,128], index: 0, kind: input, shape index: {}]   ;;  %s207_s1 = inlined_call_operand.hbm [shape: f32[8,128], index: 1, kind: input, shape index: {}]   ;;  %s208_s2 = inlined_call_operand.hbm [shape: f32[8,128], index: 2, kind: output, shape index: {}]  }
   0x1   :  { %8 = vsyncpa [#allocation6], 0 }
   0x2   :  { %9 = vsyncpa [#allocation4], 0  ;;  %s179_s9 = smov [#allocation2]   ;;  %s180_s11 = smov [#allocation5]  }
   0x3   :  { %s16_s10 = sshll.u32 %s179_s9, 4  ;;  %s26_s12 = sshll.u32 %s180_s11, 4  ;;  %s17_s10 = int_to_ptr.vmem [resolvable:$true] %s16_s10  ;;  %s27_s12 = int_to_ptr.vmem [resolvable:$true] %s26_s12 }
   0x4   :  { %s121_s13 = scalar_lea.vmem %s17_s10, 128  ;;  %p126_p1 = scmp.lt.s32.totalorder %s17_s10, %s17_s10 }
   0x5   :  { %p122_p0 = scmp.ne.s32.totalorder %s17_s10, %s121_s13  ;;  %p127_p2 = scmp.lt.s32.totalorder %s121_s13, %s121_s13 }
   0x7   :  { %p128_p3 = por %p127_p2, %p126_p1 }
   0x9   :  { %p129_p4 = pnand %p128_p3, %p122_p0 }
   0xb   :  { %132 = shalt.err (!%p129_p4)
}
   0xc   :  { %19 = dma.hbm_to_vmem [thread:$0]  %s206_s0, 128, %s17_s10, [#allocation3]  }
   0xd   :  { %s141_s16 = scalar_lea.vmem %s27_s12, 128  ;;  %p146_p6 = scmp.lt.s32.totalorder %s27_s12, %s27_s12 }
   0xe   :  { %p142_p5 = scmp.ne.s32.totalorder %s27_s12, %s141_s16  ;;  %p147_p7 = scmp.lt.s32.totalorder %s141_s16, %s141_s16 }
  0x10   :  { %p148_p8 = por %p147_p7, %p146_p6 }
  0x12   :  { %p149_p9 = pnand %p148_p8, %p142_p5 }
  0x14   :  { %152 = shalt.err (!%p149_p9)
}
  0x15   :  { %29 = dma.hbm_to_vmem [thread:$0]  %s207_s1, 128, %s27_s12, [#allocation6]  }
  0x16   :  { %173 = dma.done.wait [#allocation3], 128  }
  0x17   :  { %174 = vsyncadd [#allocation3], 4294967168 }
  0x18   :  { %175 = dma.done.wait [#allocation6], 128  }
  0x19   :  { %176 = vsyncadd [#allocation6], 4294967168  ;;  %v36_v0 = vld [vmem:[#allocation2] sm:$0xff]  ;;  %v37_v9 = vld [vmem:[#allocation5] sm:$0xff]  ;;  %v72_v10 = vlaneseq  ;;  %s181_s0 = smov [#allocation7]  }
  0x1a   :  { %v101_v1 = vmul.f32 -1.442695, %v36_v0  ;;  %v57_v2 = vand.u32 2147483647, %v36_v0  ;;  %v46_v12 = vsub.f32 1.0, %v37_v9  ;;  %v49_v15 = vmul.f32 0.25, %v37_v9 }
  0x1b   :  { %v73_v13 = vshrl.u32 %v72_v10, 7  ;;  %v54_v16 = vmax.f32 %v36_v0, 0.0  ;;  %v55_v17 = vmul.f32 %v37_v9, %v36_v0  ;;  %v75_v23 = vand.u32 127, %v72_v10  ;;  %s91_s1 = sshll.u32 %s181_s0, 4  ;;  %s92_s1 = int_to_ptr.vmem [resolvable:$true] %s91_s1 }
  0x1c   :  { %105 = vpow2.f32 %v101_v1  ;;  %v58_v3 = vsub.f32 0.0, %v57_v2  ;;  %v50_v21 = vmul.f32 0.75, %v46_v12  ;;  %s153_s19 = scalar_lea.vmem %s92_s1, 128  ;;  %p158_p11 = scmp.lt.s32.totalorder %s92_s1, %s92_s1 }
  0x1d   :  { %v79_v24 = vmul.u32 128, %v73_v13  ;;  %v56_v30 = vsub.f32 %v54_v16, %v55_v17  ;;  %p154_p10 = scmp.ne.s32.totalorder %s92_s1, %s153_s19  ;;  %p159_p12 = scmp.lt.s32.totalorder %s153_s19, %s153_s19 }
  0x1e   :  { %v59_v4 = vmul.f32 1.442695, %v58_v3  ;;  %v51_v29 = vadd.f32 %v50_v21, %v49_v15 }
  0x1f   :  { %v80_v32 = vadd.s32 %v79_v24, %v75_v23  ;;  %p160_p13 = por %p159_p12, %p158_p11 }
  0x20   :  { %107 = vpow2.f32 %v59_v4 }
  0x21   :  { %vm81_vm1 = vcmp.lt.s32.totalorder %v80_v32, 128  ;;  %p161_p0 = pnand %p160_p13, %p154_p10 }
  0x29   :  { %v106_v5 = vpop.eup %105 }
  0x2a   :  { %v41_v6 = vadd.f32 1.0, %v106_v5 }
  0x2c   :  { %109 = vrcp.f32 %v41_v6 }
  0x2d   :  { %v108_v7 = vpop.eup %107 }
  0x2e   :  { %v61_v8 = vadd.f32 1.0, %v108_v7  ;;  %v64_v11 = vmul.f32 -0.5, %v108_v7  ;;  %v67_v22 = vand.u32 2147483647, %v108_v7 }
  0x30   :  { %111 = vlog2.f32 %v61_v8  ;;  %v65_v18 = vadd.f32 1.0, %v64_v11  ;;  %vm68_vm0 = vcmp.lt.f32.partialorder %v67_v22, 0.0004427343 }
  0x32   :  { %v66_v26 = vmul.f32 %v108_v7, %v65_v18 }
  0x39   :  { %v110_v14 = vpop.eup %109 }
  0x3a   :  { %v44_v19 = vsub.f32 1.0, %v110_v14  ;;  %v47_v20 = vmul.f32 %v110_v14, %v46_v12 }
  0x3c   :  { %v45_v25 = vmul.f32 %v44_v19, %v37_v9 }
  0x3d   :  { %v112_v27 = vpop.eup %111 }
  0x3e   :  { %v48_v28 = vadd.f32 %v47_v20, %v45_v25  ;;  %v63_v31 = vmul.f32 0.6931472, %v112_v27 }
  0x40   :  { %v52_v33 = vmul.f32 %v48_v28, %v48_v28  ;;  %v69_v34 = vsel %vm68_vm0, %v66_v26, %v63_v31 }
  0x41   :  { %v70_v36 = vadd.f32 %v69_v34, %v56_v30 }
  0x42   :  { %v53_v35 = vmul.f32 %v52_v33, %v51_v29 }
  0x44   :  { %v71_v37 = vmul.f32 %v70_v36, %v53_v35 }
  0x46   :  { %v82_v38 = vsel %vm81_vm1, %v71_v37, 0.0 }
  0x47   :  { %84 = vst [vmem:[#allocation7] sm:$0xff] %v82_v38 }
  0x48   :  { %164 = shalt.err (!%p161_p0)
}
  0x49   :  { %94 = dma.vmem_to_hbm [thread:$0]  %s92_s1, 128, %s208_s2, [#allocation4]  }
  0x4a   :  { %177 = dma.done.wait [#allocation4], 128  }
  0x4b   :  { %178 = vsyncadd [#allocation4], 4294967168 }
  0x4c   :  { %98 = vsyncpa [#allocation3], 1 }
  0x4d   :  { %99 = vsyncpa [#allocation6], 1 }
  0x4e   :  { %100 = vsyncpa [#allocation4], 1 }

</bundles_post_ra>
